<compile_context>
chip_gen: v6e
topology: v6e:2x2x1
jax: 0.10.0
libtpu: 0.0.40
codegen_flags: <defaults>
</compile_context>

<pallas_src>
import functools

import jax
import jax.numpy as jnp
from jax.experimental import pallas as pl
from jax.experimental.pallas import tpu as pltpu


def _autoencoder_kernel(x_ref, w1_ref, b1_ref, w2_ref, b2_ref,
                        w3_ref, b3_ref, w4_ref, b4_ref,
                        codes_ref, decoded_ref):
    x = x_ref[...]                                                   # [Bt, D]

    # ---- encoder ----
    h = jnp.dot(x, w1_ref[...], preferred_element_type=jnp.float32) + b1_ref[...]
    h = jnp.tanh(h)                                                  # [Bt, D/2]
    codes = jnp.dot(h, w2_ref[...],
                    preferred_element_type=jnp.float32) + b2_ref[...]  # [Bt, D/4]

    # ---- decoder ----
    g = jnp.dot(codes, w3_ref[...],
                preferred_element_type=jnp.float32) + b3_ref[...]
    g = jnp.tanh(g)                                                  # [Bt, D/2]
    decoded = jnp.dot(g, w4_ref[...],
                      preferred_element_type=jnp.float32) + b4_ref[...]  # [Bt, D]

    # Single coalesced store per output block.
    codes_ref[...] = codes.astype(codes_ref.dtype)
    decoded_ref[...] = decoded.astype(decoded_ref.dtype)


def autoencoder_forward(x, w1, b1, w2, b2, w3, b3, w4, b4, *, block_b=None):
    """x: [B, D]; weights pre-transposed to [in, out]; biases [1, out].

    Returns (codes [B, D//4], decoded [B, D]).
    """
    B, D = x.shape
    H = w1.shape[1]          # D // 2
    Z = w2.shape[1]          # D // 4

    # Whole batch per grid step unless the caller asks for batch tiling.
    if block_b is None or block_b >= B:
        block_b = B
    grid = (pl.cdiv(B, block_b),)

    flops = 2 * B * (D * H + H * Z + Z * H + H * D)
    transcendentals = 2 * B * H                      # two tanh layers
    bytes_accessed = 4 * (
        B * D + D * H + H + H * Z + Z + Z * H + H + H * D + D   # inputs
        + B * Z + B * D)                                         # outputs

    shared = lambda i: (0, 0)   # batch-shared parameters, resident across steps

    codes, decoded = pl.pallas_call(
        _autoencoder_kernel,
        out_shape=(jax.ShapeDtypeStruct((B, Z), jnp.float32),
                   jax.ShapeDtypeStruct((B, D), jnp.float32)),
        grid=grid,
        in_specs=[
            pl.BlockSpec((block_b, D), lambda i: (i, 0)),   # x  (batch tile)
            pl.BlockSpec((D, H), shared),                   # W1^T
            pl.BlockSpec((1, H), shared),                   # b1
            pl.BlockSpec((H, Z), shared),                   # W2^T
            pl.BlockSpec((1, Z), shared),                   # b2
            pl.BlockSpec((Z, H), shared),                   # W3^T
            pl.BlockSpec((1, H), shared),                   # b3
            pl.BlockSpec((H, D), shared),                   # W4^T
            pl.BlockSpec((1, D), shared),                   # b4
        ],
        out_specs=(pl.BlockSpec((block_b, Z), lambda i: (i, 0)),
                   pl.BlockSpec((block_b, D), lambda i: (i, 0))),
        compiler_params=pltpu.CompilerParams(
            dimension_semantics=("parallel",)),
        cost_estimate=pl.CostEstimate(flops=flops,
                                      transcendentals=transcendentals,
                                      bytes_accessed=bytes_accessed),
    )(x, w1, b1, w2, b2, w3, b3, w4, b4)
    return codes, decoded


def _reference_forward(x, w1, b1, w2, b2, w3, b3, w4, b4):
    h = jnp.tanh(x @ w1 + b1)
    codes = h @ w2 + b2
    g = jnp.tanh(codes @ w3 + b3)
    decoded = g @ w4 + b4
    return codes, decoded


if __name__ == "__main__":
    # Small, consistent shapes.
    B = 8              # batch
    D = 32             # input_dim
    H = D // 2         # 16
    Z = D // 4         # 8

    key = jax.random.PRNGKey(0)
    ks = jax.random.split(key, 9)

    x = jax.random.normal(ks[0], (B, D), jnp.float32)

    # PyTorch nn.Linear stores weights as [out, in]; we pass them pre-transposed
    # to [in, out] so the kernel never transposes.
    w1 = jax.random.normal(ks[1], (D, H), jnp.float32) * 0.1
    b1 = jax.random.normal(ks[2], (1, H), jnp.float32) * 0.1
    w2 = jax.random.normal(ks[3], (H, Z), jnp.float32) * 0.1
    b2 = jax.random.normal(ks[4], (1, Z), jnp.float32) * 0.1
    w3 = jax.random.normal(ks[5], (Z, H), jnp.float32) * 0.1
    b3 = jax.random.normal(ks[6], (1, H), jnp.float32) * 0.1
    w4 = jax.random.normal(ks[7], (H, D), jnp.float32) * 0.1
    b4 = jax.random.normal(ks[8], (1, D), jnp.float32) * 0.1

    codes, decoded = autoencoder_forward(x, w1, b1, w2, b2, w3, b3, w4, b4)
    jax.block_until_ready((codes, decoded))

    assert codes.shape == (B, Z)
    assert decoded.shape == (B, D)

    ref_codes, ref_decoded = _reference_forward(x, w1, b1, w2, b2, w3, b3, w4, b4)
    assert jnp.allclose(codes, ref_codes, atol=1e-5, rtol=1e-5)
    assert jnp.allclose(decoded, ref_decoded, atol=1e-5, rtol=1e-5)

    print("KERNEL_OK")
</pallas_src>

<mosaic_0001>
module attributes {stable_mosaic.version = 11 : i64} {
  func.func @_autoencoder_kernel(%arg0: i32, %arg1: memref<8x32xf32, #tpu.memory_space<vmem>>, %arg2: memref<32x16xf32, #tpu.memory_space<vmem>>, %arg3: memref<1x16xf32, #tpu.memory_space<vmem>>, %arg4: memref<16x8xf32, #tpu.memory_space<vmem>>, %arg5: memref<1x8xf32, #tpu.memory_space<vmem>>, %arg6: memref<8x16xf32, #tpu.memory_space<vmem>>, %arg7: memref<1x16xf32, #tpu.memory_space<vmem>>, %arg8: memref<16x32xf32, #tpu.memory_space<vmem>>, %arg9: memref<1x32xf32, #tpu.memory_space<vmem>>, %arg10: memref<8x8xf32, #tpu.memory_space<vmem>>, %arg11: memref<8x32xf32, #tpu.memory_space<vmem>>) attributes {dimension_semantics = [#tpu.dimension_semantics<parallel>], iteration_bounds = array<i64: 1>, scalar_prefetch = 0 : i64, scratch_operands = 0 : i64, tpu.core_type = #tpu.core_type<tc>, window_params = [{transform_indices = @transform_0, window_bounds = array<i64: 8, 32>}, {pipeline_mode = #tpu.pipeline_mode<synchronous>, transform_indices = @transform_1, window_bounds = array<i64: 32, 16>}, {pipeline_mode = #tpu.pipeline_mode<synchronous>, transform_indices = @transform_2, window_bounds = array<i64: 1, 16>}, {pipeline_mode = #tpu.pipeline_mode<synchronous>, transform_indices = @transform_3, window_bounds = array<i64: 16, 8>}, {pipeline_mode = #tpu.pipeline_mode<synchronous>, transform_indices = @transform_4, window_bounds = array<i64: 1, 8>}, {pipeline_mode = #tpu.pipeline_mode<synchronous>, transform_indices = @transform_5, window_bounds = array<i64: 8, 16>}, {pipeline_mode = #tpu.pipeline_mode<synchronous>, transform_indices = @transform_6, window_bounds = array<i64: 1, 16>}, {pipeline_mode = #tpu.pipeline_mode<synchronous>, transform_indices = @transform_7, window_bounds = array<i64: 16, 32>}, {pipeline_mode = #tpu.pipeline_mode<synchronous>, transform_indices = @transform_8, window_bounds = array<i64: 1, 32>}, {transform_indices = @transform_9, window_bounds = array<i64: 8, 8>}, {transform_indices = @transform_10, window_bounds = array<i64: 8, 32>}]} {
    %c0 = arith.constant 0 : index
    %c0_0 = arith.constant 0 : index
    %0 = vector.load %arg1[%c0, %c0_0] : memref<8x32xf32, #tpu.memory_space<vmem>>, vector<8x32xf32>
    %c0_1 = arith.constant 0 : index
    %c0_2 = arith.constant 0 : index
    %1 = vector.load %arg2[%c0_1, %c0_2] : memref<32x16xf32, #tpu.memory_space<vmem>>, vector<32x16xf32>
    %cst = arith.constant dense<0.000000e+00> : vector<8x16xf32>
    %2 = tpu.matmul %0, %1, %cst {dimension_numbers = #tpu.dot_dimension_numbers<[1], [0], [0], [1], [0, 0, 1, 1], [], []>} : vector<8x32xf32>, vector<32x16xf32>, vector<8x16xf32> -> vector<8x16xf32>
    %c0_3 = arith.constant 0 : index
    %c0_4 = arith.constant 0 : index
    %3 = vector.load %arg3[%c0_3, %c0_4] : memref<1x16xf32, #tpu.memory_space<vmem>>, vector<1x16xf32>
    %4 = vector.broadcast %3 : vector<1x16xf32> to vector<8x16xf32>
    %5 = arith.addf %2, %4 : vector<8x16xf32>
    %6 = math.tanh %5 : vector<8x16xf32>
    %c0_5 = arith.constant 0 : index
    %c0_6 = arith.constant 0 : index
    %7 = vector.load %arg4[%c0_5, %c0_6] : memref<16x8xf32, #tpu.memory_space<vmem>>, vector<16x8xf32>
    %cst_7 = arith.constant dense<0.000000e+00> : vector<8x8xf32>
    %8 = tpu.matmul %6, %7, %cst_7 {dimension_numbers = #tpu.dot_dimension_numbers<[1], [0], [0], [1], [0, 0, 1, 1], [], []>} : vector<8x16xf32>, vector<16x8xf32>, vector<8x8xf32> -> vector<8x8xf32>
    %c0_8 = arith.constant 0 : index
    %c0_9 = arith.constant 0 : index
    %9 = vector.load %arg5[%c0_8, %c0_9] : memref<1x8xf32, #tpu.memory_space<vmem>>, vector<1x8xf32>
    %10 = vector.broadcast %9 : vector<1x8xf32> to vector<8x8xf32>
    %11 = arith.addf %8, %10 : vector<8x8xf32>
    %c0_10 = arith.constant 0 : index
    %c0_11 = arith.constant 0 : index
    %12 = vector.load %arg6[%c0_10, %c0_11] : memref<8x16xf32, #tpu.memory_space<vmem>>, vector<8x16xf32>
    %cst_12 = arith.constant dense<0.000000e+00> : vector<8x16xf32>
    %13 = tpu.matmul %11, %12, %cst_12 {dimension_numbers = #tpu.dot_dimension_numbers<[1], [0], [0], [1], [0, 0, 1, 1], [], []>} : vector<8x8xf32>, vector<8x16xf32>, vector<8x16xf32> -> vector<8x16xf32>
    %c0_13 = arith.constant 0 : index
    %c0_14 = arith.constant 0 : index
    %14 = vector.load %arg7[%c0_13, %c0_14] : memref<1x16xf32, #tpu.memory_space<vmem>>, vector<1x16xf32>
    %15 = vector.broadcast %14 : vector<1x16xf32> to vector<8x16xf32>
    %16 = arith.addf %13, %15 : vector<8x16xf32>
    %17 = math.tanh %16 : vector<8x16xf32>
    %c0_15 = arith.constant 0 : index
    %c0_16 = arith.constant 0 : index
    %18 = vector.load %arg8[%c0_15, %c0_16] : memref<16x32xf32, #tpu.memory_space<vmem>>, vector<16x32xf32>
    %cst_17 = arith.constant dense<0.000000e+00> : vector<8x32xf32>
    %19 = tpu.matmul %17, %18, %cst_17 {dimension_numbers = #tpu.dot_dimension_numbers<[1], [0], [0], [1], [0, 0, 1, 1], [], []>} : vector<8x16xf32>, vector<16x32xf32>, vector<8x32xf32> -> vector<8x32xf32>
    %c0_18 = arith.constant 0 : index
    %c0_19 = arith.constant 0 : index
    %20 = vector.load %arg9[%c0_18, %c0_19] : memref<1x32xf32, #tpu.memory_space<vmem>>, vector<1x32xf32>
    %21 = vector.broadcast %20 : vector<1x32xf32> to vector<8x32xf32>
    %22 = arith.addf %19, %21 : vector<8x32xf32>
    %c0_20 = arith.constant 0 : index
    %c0_21 = arith.constant 0 : index
    %23 = vector.load %arg10[%c0_20, %c0_21] : memref<8x8xf32, #tpu.memory_space<vmem>>, vector<8x8xf32>
    tpu.vector_store %arg10[%c0_20, %c0_21], %11 {strides = array<i32>} : memref<8x8xf32, #tpu.memory_space<vmem>>, vector<8x8xf32>,
    %c0_22 = arith.constant 0 : index
    %c0_23 = arith.constant 0 : index
    %24 = vector.load %arg11[%c0_22, %c0_23] : memref<8x32xf32, #tpu.memory_space<vmem>>, vector<8x32xf32>
    tpu.vector_store %arg11[%c0_22, %c0_23], %22 {strides = array<i32>} : memref<8x32xf32, #tpu.memory_space<vmem>>, vector<8x32xf32>,
    return
  }
  func.func @transform_0(%arg0: i32) -> (i32, i32) {
    %c0_i32 = arith.constant 0 : i32
    %c0_i32_0 = arith.constant 0 : i32
    return %arg0, %c0_i32 : i32, i32
  }
  func.func @transform_1(%arg0: i32) -> (i32, i32) {
    %c0_i32 = arith.constant 0 : i32
    %c0_i32_0 = arith.constant 0 : i32
    %c0_i32_1 = arith.constant 0 : i32
    return %c0_i32, %c0_i32_0 : i32, i32
  }
  func.func @transform_2(%arg0: i32) -> (i32, i32) {
    %c0_i32 = arith.constant 0 : i32
    %c0_i32_0 = arith.constant 0 : i32
    %c0_i32_1 = arith.constant 0 : i32
    return %c0_i32, %c0_i32_0 : i32, i32
  }
  func.func @transform_3(%arg0: i32) -> (i32, i32) {
    %c0_i32 = arith.constant 0 : i32
    %c0_i32_0 = arith.constant 0 : i32
    %c0_i32_1 = arith.constant 0 : i32
    return %c0_i32, %c0_i32_0 : i32, i32
  }
  func.func @transform_4(%arg0: i32) -> (i32, i32) {
    %c0_i32 = arith.constant 0 : i32
    %c0_i32_0 = arith.constant 0 : i32
    %c0_i32_1 = arith.constant 0 : i32
    return %c0_i32, %c0_i32_0 : i32, i32
  }
  func.func @transform_5(%arg0: i32) -> (i32, i32) {
    %c0_i32 = arith.constant 0 : i32
    %c0_i32_0 = arith.constant 0 : i32
    %c0_i32_1 = arith.constant 0 : i32
    return %c0_i32, %c0_i32_0 : i32, i32
  }
  func.func @transform_6(%arg0: i32) -> (i32, i32) {
    %c0_i32 = arith.constant 0 : i32
    %c0_i32_0 = arith.constant 0 : i32
    %c0_i32_1 = arith.constant 0 : i32
    return %c0_i32, %c0_i32_0 : i32, i32
  }
  func.func @transform_7(%arg0: i32) -> (i32, i32) {
    %c0_i32 = arith.constant 0 : i32
    %c0_i32_0 = arith.constant 0 : i32
    %c0_i32_1 = arith.constant 0 : i32
    return %c0_i32, %c0_i32_0 : i32, i32
  }
  func.func @transform_8(%arg0: i32) -> (i32, i32) {
    %c0_i32 = arith.constant 0 : i32
    %c0_i32_0 = arith.constant 0 : i32
    %c0_i32_1 = arith.constant 0 : i32
    return %c0_i32, %c0_i32_0 : i32, i32
  }
  func.func @transform_9(%arg0: i32) -> (i32, i32) {
    %c0_i32 = arith.constant 0 : i32
    %c0_i32_0 = arith.constant 0 : i32
    return %arg0, %c0_i32 : i32, i32
  }
  func.func @transform_10(%arg0: i32) -> (i32, i32) {
    %c0_i32 = arith.constant 0 : i32
    %c0_i32_0 = arith.constant 0 : i32
    return %arg0, %c0_i32 : i32, i32
  }
}

</mosaic_0001>

<bundles_post_ra>
// kernel: tpu_custom_call.1
= control target key start
LH: loop header
LB: loop body
LE: loop exit
PB: predicated region body
PF: predicated region fallthrough
CT: control target
= control target key end

     0   :  { %16 = vsyncpa [#allocation3], 0  ;;  %v504_v1 = vmov 0.0   ;;  %vm505_vm0 = vmmov 0   ;;  %s619_s0 = inlined_call_operand.vmem [shape: f32[8,32], index: 0, kind: input, shape index: {}]   ;;  %s620_s1 = inlined_call_operand.vmem [shape: f32[32,16], index: 1, kind: input, shape index: {}]   ;;  %s621_s2 = inlined_call_operand.vmem [shape: f32[1,16], index: 2, kind: input, shape index: {}]   ;;  %s622_s3 = inlined_call_operand.vmem [shape: f32[16,8], index: 3, kind: input, shape index: {}]   ;;  %s623_s4 = inlined_call_operand.vmem [shape: f32[1,8], index: 4, kind: input, shape index: {}]   ;;  %s624_s5 = inlined_call_operand.vmem [shape: f32[8,16], index: 5, kind: input, shape index: {}]   ;;  %s625_s6 = inlined_call_operand.vmem [shape: f32[1,16], index: 6, kind: input, shape index: {}]   ;;  %s626_s7 = inlined_call_operand.vmem [shape: f32[16,32], index: 7, kind: input, shape index: {}]   ;;  %s627_s8 = inlined_call_operand.vmem [shape: f32[1,32], index: 8, kind: input, shape index: {}]   ;;  %s628_s9 = inlined_call_operand.hbm [shape: f32[8,8], index: 9, kind: output, shape index: {0}]   ;;  %s629_s10 = inlined_call_operand.hbm [shape: f32[8,32], index: 10, kind: output, shape index: {1}]  }
   0x1   :  { %v40_v0 = vld [vmem:[%s620_s1 + $0x18] sm:$0xff]  ;;  %422 = vmatprep.subr.mxu0 %v504_v1  ;;  %v39_v2 = vld [vmem:[%s620_s1 + $0x10] sm:$0xff]  ;;  %430 = vmatprep.mubr.msk.f32.mxu0 %vm505_vm0, %v504_v1 }
   0x2   :  { %423 = vmatpush3.msra.mxu0 %v40_v0  ;;  %433 = vmatprep.subr.mxu1 %v504_v1 }
   0x3   :  { %17 = vsyncpa [#allocation5], 0  ;;  %424 = vmatprep.subr.mxu0 %v504_v1  ;;  %v38_v3 = vld [vmem:[%s620_s1 + $0x8] sm:$0xff]  ;;  %437 = vmatprep.mubr.msk.f32.mxu1 %vm505_vm0, %v504_v1  ;;  %v37_v4 = vld [vmem:[%s620_s1] sm:$0xff]  ;;  %vm48_vm1 = vcmask 261120   ;;  %vm132_vm2 = vcmask 130048  }
   0x4   :  { %425 = vmatpush3.msra.mxu0 %v39_v2  ;;  %v36_v5 = vld [vmem:[%s619_s0] sm:$0xff]  ;;  %v124_v6 = vld [vmem:[%s622_s3 + $0x8] sm:$0xff]  ;;  %vm214_vm3 = vcmask 64512  }
   0x5   :  { %426 = vmatprep.subr.mxu0 %v504_v1  ;;  %v123_v7 = vld [vmem:[%s622_s3] sm:$0xff]  ;;  %434 = vmatpush3.msra.mxu1 %v124_v6  ;;  %v290_v18 = vld [vmem:[%s626_s7 + $0x8] sm:$0xff] }
   0x6   :  { %427 = vmatpush3.msra.mxu0 %v38_v3  ;;  %435 = vmatprep.subr.mxu1 %v504_v1  ;;  %v401_v8 = vld [vmem:[%s621_s2] ss:$0 sm:$0xff] }
   0x7   :  { %428 = vmatprep.subr.mxu0 %v504_v1  ;;  %436 = vmatpush3.msra.mxu1 %v123_v7  ;;  %v206_v12 = vld [vmem:[%s624_s5] sm:$0xff] }
   0x8   :  { %429 = vmatpush3.msra.mxu0 %v37_v4  ;;  %440 = vmatprep.subr.mxu1 %v504_v1  ;;  %v403_v14 = vld [vmem:[%s623_s4] ss:$0 sm:$0xff]  ;;  %s506_s4 = smov [#allocation2]  }
   0x9   :  { %431 = vmatmul.mubr.msk.f32.vlgmr.msra.gmra.mxu0 %vm48_vm1, %v36_v5  ;;  %445 = vmatprep.subr.mxu0 %v504_v1  ;;  %v289_v19 = vld [vmem:[%s626_s7] sm:$0xff]  ;;  %s379_s14 = sshll.u32 %s506_s4, 4  ;;  %s380_s14 = int_to_ptr.vmem [resolvable:$true] %s379_s14 }
   0xa   :  { %449 = vmatprep.mubr.msk.f32.mxu0 %vm505_vm0, %v504_v1  ;;  %446 = vmatpush3.msra.mxu0 %v290_v18  ;;  %v405_v20 = vld [vmem:[%s625_s6] ss:$0 sm:$0xff]  ;;  %s460_s15 = scalar_lea.vmem %s380_s14, 128  ;;  %p465_p1 = scmp.lt.s32.totalorder %s380_s14, %s380_s14 }
   0xb   :  { %447 = vmatprep.subr.mxu0 %v504_v1  ;;  %p461_p0 = scmp.ne.s32.totalorder %s380_s14, %s460_s15  ;;  %p466_p2 = scmp.lt.s32.totalorder %s460_s15, %s460_s15 }
   0xc   :  { %448 = vmatpush3.msra.mxu0 %v289_v19 }
   0xd   :  { %p467_p3 = por %p466_p2, %p465_p1 }
   0xf   :  { %p468_p4 = pnand %p467_p3, %p461_p0 }
  0xc9   :  { %v118_v9 = vpop.f32.mrf.mxu0 }
  0xca   :  { %v119_v10 = vadd.f32 %v401_v8, %v118_v9 }
  0xcb   :  { %v432_v11 = vpop.f32.mrf.mxu0 }
  0xcc   :  { %456 = vtanh.f32 %v119_v10 }
  0xd9   :  { %v457_v13 = vpop.eup %456 }
  0xda   :  { %438 = vmatmul.mubr.msk.f32.vlgmr.msra.gmra.mxu1 %vm132_vm2, %v457_v13 }
  0xdb   :  { %441 = vmatpush3.msra.mxu1 %v206_v12  ;;  %442 = vmatprep.mubr.msk.f32.mxu1 %vm505_vm0, %v504_v1 }
 0x19a   :  { %v202_v15 = vpop.f32.mrf.mxu1 }
 0x19b   :  { %v203_v16 = vadd.f32 %v403_v14, %v202_v15 }
 0x19c   :  { %v439_v17 = vpop.f32.mrf.mxu1 }
 0x19d   :  { %443 = vmatmul.mubr.msk.f32.vlgmr.msra.gmra.mxu1 %vm214_vm3, %v203_v16  ;;  %371 = vst.msk [vmem:[#allocation2] sm:$0xff] %vm214_vm3, %v203_v16 }
 0x25d   :  { %v284_v21 = vpop.f32.mrf.mxu1 }
 0x25e   :  { %v285_v22 = vadd.f32 %v405_v20, %v284_v21 }
 0x25f   :  { %v444_v23 = vpop.f32.mrf.mxu1 }
 0x260   :  { %458 = vtanh.f32 %v285_v22 }
 0x26d   :  { %v459_v24 = vpop.eup %458 }
 0x26e   :  { %450 = vmatmul.mubr.msk.f32.vlgmr.msra.gmra.mxu0 %vm132_vm2, %v459_v24 }
 0x26f   :  { %471 = shalt.err (!%p468_p4)
}
 0x270   :  { %382 = dma.vmem_to_hbm [thread:$0]  %s380_s14, 128, %s628_s9, [#allocation3]   ;;  %v407_v25 = vld [vmem:[%s627_s8] ss:$0 sm:$0xff] }
 0x271   :  { %s507_s18 = smov [#allocation4]  }
 0x272   :  { %s389_s19 = sshll.u32 %s507_s18, 4  ;;  %s390_s19 = int_to_ptr.vmem [resolvable:$true] %s389_s19 }
 0x273   :  { %s480_s20 = scalar_lea.vmem %s390_s19, 128  ;;  %p485_p6 = scmp.lt.s32.totalorder %s390_s19, %s390_s19 }
 0x274   :  { %p481_p5 = scmp.ne.s32.totalorder %s390_s19, %s480_s20  ;;  %p486_p7 = scmp.lt.s32.totalorder %s480_s20, %s480_s20 }
 0x276   :  { %p487_p8 = por %p486_p7, %p485_p6 }
 0x278   :  { %p488_p9 = pnand %p487_p8, %p481_p5 }
 0x32e   :  { %v367_v26 = vpop.f32.mrf.mxu0 }
 0x32f   :  { %v368_v27 = vadd.f32 %v407_v25, %v367_v26 }
 0x330   :  { %v451_v28 = vpop.f32.mrf.mxu0 }
 0x331   :  { %372 = vst.msk [vmem:[#allocation4] sm:$0xff] %vm48_vm1, %v368_v27 }
 0x332   :  { %491 = shalt.err (!%p488_p9)
}
 0x333   :  { %392 = dma.vmem_to_hbm [thread:$0]  %s390_s19, 128, %s629_s10, [#allocation5]  }
 0x334   :  { %500 = dma.done.wait [#allocation3], 128  }
 0x335   :  { %501 = vsyncadd [#allocation3], 4294967168 }
 0x336   :  { %502 = dma.done.wait [#allocation5], 128  }
 0x337   :  { %503 = vsyncadd [#allocation5], 4294967168 }
 0x338   :  { %399 = vsyncpa [#allocation3], 1 }
 0x339   :  { %400 = vsyncpa [#allocation5], 1 }

</bundles_post_ra>
